<compile_context>
chip_gen: v7x
topology: tpu7x:2x2x1
jax: 0.10.0
libtpu: 0.0.40
codegen_flags: <defaults>
</compile_context>

<pallas_src>
import jax
import jax.numpy as jnp
from jax.experimental import pallas as pl
from jax.experimental.pallas import tpu as pltpu

# Per-block VMEM budget.  Input + output are each double-buffered, so peak
# VMEM use is ~4x this (16 MiB), which fits comfortably under the 32 MiB
# scoped limit we request below on every TPU generation (v7x physical VMEM
# is 64 MiB, v5e/v6e 128 MiB).
_BLOCK_BUDGET_BYTES = 4 * 1024 * 1024
_VMEM_LIMIT_BYTES = 32 * 1024 * 1024


def _identity_kernel(x_ref, o_ref):
    # Elementwise pass-through on the current VMEM block.
    o_ref[...] = x_ref[...]


def _tile_plan(rows: int, cols: int, itemsize: int):
    """Pick (row_block, col_block) without requiring any padding.

    Block dims are either the full array extent (exempt from the (8,128)
    divisibility rule) or dtype-aware multiples of the native tile.
    """
    sublane = max(8, 32 // itemsize)      # 8 rows f32, 16 bf16, 32 int8/fp8

    # Whole slab fits in one block -> single grid step, one big DMA each way.
    if rows * cols * itemsize <= _BLOCK_BUDGET_BYTES:
        return rows, cols

    # Full-width (lane-dense) row chunks, sized against the VMEM budget.
    bytes_per_row = cols * itemsize
    max_rows = (_BLOCK_BUDGET_BYTES // bytes_per_row) // sublane * sublane
    if max_rows >= sublane:
        return min(max_rows, rows), cols

    # A single sublane group of full-width rows is already too big:
    # tile the lane dim too, in large multiples of 128.
    max_lanes = (_BLOCK_BUDGET_BYTES // (sublane * itemsize)) // 128 * 128
    max_lanes = max(128, max_lanes)
    return sublane, min(max_lanes, cols)


def basenet_forward(x: jax.Array) -> jax.Array:
    """BaseNet.forward equivalent (identity; no parameters).

    Accepts an NCHW array [N, C, H, W] (any >=2-D array works); returns an
    array of identical shape/dtype, streamed through VMEM.
    """
    orig_shape = x.shape
    if x.ndim >= 2:
        cols = orig_shape[-1] * orig_shape[-2]   # H*W: lane-dense, no padding
    else:
        cols = x.size
    cols = max(cols, 1)
    rows = max(x.size // cols, 1)
    x2d = x.reshape(rows, cols)

    itemsize = jnp.dtype(x.dtype).itemsize
    rb, cb = _tile_plan(rows, cols, itemsize)
    grid = (pl.cdiv(rows, rb), pl.cdiv(cols, cb))

    out2d = pl.pallas_call(
        _identity_kernel,
        out_shape=jax.ShapeDtypeStruct((rows, cols), x.dtype),
        grid=grid,
        in_specs=[pl.BlockSpec((rb, cb), lambda i, j: (i, j))],
        out_specs=pl.BlockSpec((rb, cb), lambda i, j: (i, j)),
        input_output_aliases={0: 0},
        compiler_params=pltpu.CompilerParams(
            dimension_semantics=("parallel", "parallel"),
            vmem_limit_bytes=_VMEM_LIMIT_BYTES,
        ),
    )(x2d)

    return out2d.reshape(orig_shape)


def basenet_num_params() -> int:
    # BaseNet defines no parameters.
    return 0


if __name__ == "__main__":
    key = jax.random.PRNGKey(0)
    # Small NCHW input consistent with a conv-style network interface.
    x = jax.random.normal(key, (2, 4, 16, 16), dtype=jnp.float32)

    y = basenet_forward(x)
    jax.block_until_ready(y)

    assert y.shape == x.shape and y.dtype == x.dtype
    assert bool(jnp.allclose(y, x))
    assert basenet_num_params() == 0

    print("KERNEL_OK")
</pallas_src>

<mosaic_0001>
module attributes {stable_mosaic.version = 11 : i64} {
  func.func @_identity_kernel(%arg0: i32, %arg1: i32, %arg2: memref<8x256xf32, #tpu.memory_space<vmem>>, %arg3: memref<8x256xf32, #tpu.memory_space<vmem>>) attributes {dimension_semantics = [#tpu.dimension_semantics<parallel>, #tpu.dimension_semantics<parallel>], iteration_bounds = array<i64: 1, 1>, scalar_prefetch = 0 : i64, scratch_operands = 0 : i64, tpu.core_type = #tpu.core_type<tc>, window_params = [{transform_indices = @transform_0, window_bounds = array<i64: 8, 256>}, {transform_indices = @transform_1, window_bounds = array<i64: 8, 256>}]} {
    %c0 = arith.constant 0 : index
    %c0_0 = arith.constant 0 : index
    %0 = vector.load %arg2[%c0, %c0_0] : memref<8x256xf32, #tpu.memory_space<vmem>>, vector<8x256xf32>
    %c0_1 = arith.constant 0 : index
    %c0_2 = arith.constant 0 : index
    %1 = vector.load %arg3[%c0_1, %c0_2] : memref<8x256xf32, #tpu.memory_space<vmem>>, vector<8x256xf32>
    tpu.vector_store %arg3[%c0_1, %c0_2], %0 {strides = array<i32>} : memref<8x256xf32, #tpu.memory_space<vmem>>, vector<8x256xf32>,
    return
  }
  func.func @transform_0(%arg0: i32, %arg1: i32) -> (i32, i32) {
    %c0_i32 = arith.constant 0 : i32
    return %arg0, %arg1 : i32, i32
  }
  func.func @transform_1(%arg0: i32, %arg1: i32) -> (i32, i32) {
    %c0_i32 = arith.constant 0 : i32
    return %arg0, %arg1 : i32, i32
  }
}

</mosaic_0001>

<bundles_post_ra>
// kernel: tpu_custom_call.1
= control target key start
LH: loop header
LB: loop body
LE: loop exit
PB: predicated region body
PF: predicated region fallthrough
CT: control target
= control target key end

     0   :  { %6 = vsyncpa [#allocation3], 0  ;;  %s126_s0 = inlined_call_operand.hbm [shape: f32[8,256], index: 0, kind: input, shape index: {}, may-alias: {0,1}]   ;;  %s127_s1 = inlined_call_operand.hbm [shape: f32[8,256], index: 1, kind: output, shape index: {}, may-alias: {0,1}]  }
   0x1   :  { %7 = vsyncpa [#allocation4], 0  ;;  %s90_s6 = smov [#allocation2]   ;;  %s42_s10 = scalar_lea.hbm %s126_s0, 256 }
   0x2   :  { %s14_s7 = sshll.u32 %s90_s6, 4  ;;  %p43_p0 = scmp.ne.s32.totalorder %s126_s0, %s42_s10  ;;  %s15_s7 = int_to_ptr.vmem [resolvable:$true] %s14_s7 }
   0x3   :  { %p46_p1 = scmp.lt.u32.totalorder %s42_s10, %s126_s0 }
   0x5   :  { %p48_p2 = pnand %p46_p1, %p43_p0 }
   0x7   :  { %51 = shalt.err (!%p48_p2)
}
   0x8   :  { %s52_s15 = scalar_lea.vmem %s15_s7, 256  ;;  %p57_p4 = scmp.lt.s32.totalorder %s15_s7, %s15_s7 }
   0x9   :  { %p53_p3 = scmp.ne.s32.totalorder %s15_s7, %s52_s15  ;;  %p58_p5 = scmp.lt.s32.totalorder %s52_s15, %s52_s15 }
   0xb   :  { %p59_p6 = por %p58_p5, %p57_p4 }
   0xd   :  { %p60_p7 = pnand %p59_p6, %p53_p3 }
   0xf   :  { %63 = shalt.err (!%p60_p7)
}
  0x10   :  { %17 = dma.hbm_to_vmem [thread:$0]  %s126_s0, 256, %s15_s7, [#allocation3]  }
  0x11   :  { %86 = dma.done.wait [#allocation3], 256  }
  0x12   :  { %87 = vsyncadd [#allocation3], 4294967040  ;;  %s91_s18 = smov [#allocation5]   ;;  %v21_v0 = vld [vmem:[#allocation2] sm:$0xff]  ;;  %v22_v1 = vld [vmem:[#allocation2 + $0x8] sm:$0xff] }
  0x13   :  { %s31_s19 = sshll.u32 %s91_s18, 4  ;;  %23 = vst [vmem:[#allocation5] sm:$0xff] %v21_v0  ;;  %24 = vst [vmem:[#allocation5 + $0x8] sm:$0xff] %v22_v1  ;;  %s32_s19 = int_to_ptr.vmem [resolvable:$true] %s31_s19 }
  0x14   :  { %s64_s20 = scalar_lea.vmem %s32_s19, 256  ;;  %p69_p9 = scmp.lt.s32.totalorder %s32_s19, %s32_s19 }
  0x15   :  { %p65_p8 = scmp.ne.s32.totalorder %s32_s19, %s64_s20  ;;  %p70_p10 = scmp.lt.s32.totalorder %s64_s20, %s64_s20 }
  0x17   :  { %p71_p11 = por %p70_p10, %p69_p9 }
  0x19   :  { %p72_p12 = pnand %p71_p11, %p65_p8 }
  0x1b   :  { %75 = shalt.err (!%p72_p12)
}
  0x1c   :  { %s76_s0 = scalar_lea.hbm %s127_s1, 256 }
  0x1d   :  { %p77_p13 = scmp.ne.s32.totalorder %s127_s1, %s76_s0  ;;  %p80_p0 = scmp.lt.u32.totalorder %s76_s0, %s127_s1 }
  0x1f   :  { %p82_p1 = pnand %p80_p0, %p77_p13 }
  0x21   :  { %85 = shalt.err (!%p82_p1)
}
  0x22   :  { %34 = dma.vmem_to_hbm [thread:$0]  %s32_s19, 256, %s127_s1, [#allocation4]  }
  0x23   :  { %88 = dma.done.wait [#allocation4], 256  }
  0x24   :  { %89 = vsyncadd [#allocation4], 4294967040 }
  0x25   :  { %38 = vsyncpa [#allocation3], 1 }
  0x26   :  { %39 = vsyncpa [#allocation4], 1 }

</bundles_post_ra>
